<compile_context>
chip_gen: v7x
topology: tpu7x:2x2x1
jax: 0.10.0
libtpu: 0.0.40
codegen_flags: <defaults>
</compile_context>

<pallas_src>
import jax
import jax.numpy as jnp
from jax.experimental import pallas as pl
from jax.experimental.pallas import tpu as pltpu


def _copy_kernel(x_ref, o_ref):
    # Pure passthrough copy of one lane-dense (tile_rows, C*H*W) block.
    o_ref[...] = x_ref[...]


def _choose_row_tile(n_rows, row_bytes, max_block_bytes=4 * 1024 * 1024):
    """Pick a row-tile size: multiple of 8 (sublane) dividing n_rows, block <= max_block_bytes.

    Falls back to the full extent (always legal for BlockSpec) when n_rows is not
    a multiple of 8 or when everything already fits in one block.
    """
    if n_rows % 8 != 0:
        return n_rows
    if n_rows * row_bytes <= max_block_bytes:
        return n_rows
    best = 8
    r = 8
    while r <= n_rows:
        if n_rows % r == 0 and r * row_bytes <= max_block_bytes:
            best = r
        r += 8
    return best


def custom_split(x, B):
    """rearrange(x, '(b t) c h w -> b t c h w', b=B) via a lane-dense Pallas copy."""
    BT, C, H, W = x.shape
    assert BT % B == 0, "leading dim must be divisible by b"
    T = BT // B
    F = C * H * W

    # Metadata-only reshape to a lane-dense 2-D view (no HBM traffic).
    x2 = x.reshape(BT, F)

    itemsize = jnp.dtype(x.dtype).itemsize
    tile_rows = _choose_row_tile(BT, F * itemsize)
    grid = (BT // tile_rows,)

    out2 = pl.pallas_call(
        _copy_kernel,
        out_shape=jax.ShapeDtypeStruct((BT, F), x.dtype),
        grid_spec=pltpu.PrefetchScalarGridSpec(
            num_scalar_prefetch=0,
            grid=grid,
            in_specs=[pl.BlockSpec((tile_rows, F), lambda i: (i, 0))],
            out_specs=pl.BlockSpec((tile_rows, F), lambda i: (i, 0)),
        ),
        compiler_params=pltpu.CompilerParams(
            dimension_semantics=("parallel",),
            # 4 MiB blocks, double-buffered in+out <= 16 MiB; 32 MiB covers v5e too.
            vmem_limit_bytes=32 * 1024 * 1024,
        ),
        cost_estimate=pl.CostEstimate(
            flops=0,
            transcendentals=0,
            bytes_accessed=2 * BT * F * itemsize,
        ),
    )(x2)

    # Free reshape into the rearranged (B, T, C, H, W) layout.
    return out2.reshape(B, T, C, H, W)


class InstanceHelper:
    def __init__(self, B):
        self.B = B


class CustomSplit:
    """JAX/Pallas port of the PyTorch CustomSplit module."""

    def __init__(self, pattern, instance_helper):
        # Only the canonical pattern used by this pipeline is supported.
        assert pattern == "(b t) c h w -> b t c h w", (
            "only '(b t) c h w -> b t c h w' is implemented"
        )
        self.pattern = pattern
        self.instance_helper = instance_helper

    def __call__(self, x):
        return custom_split(x, self.instance_helper.B)


if __name__ == "__main__":
    key = jax.random.PRNGKey(0)
    B, T, C, H, W = 2, 4, 4, 16, 16
    x = jax.random.normal(key, (B * T, C, H, W), dtype=jnp.float32)

    module = CustomSplit("(b t) c h w -> b t c h w", InstanceHelper(B))
    out = module(x)
    out = jax.block_until_ready(out)

    # Reference: rearrange '(b t) c h w -> b t c h w' == contiguous reshape.
    ref = x.reshape(B, T, C, H, W)
    assert out.shape == (B, T, C, H, W)
    assert out.dtype == x.dtype
    assert jnp.array_equal(out, ref), "Pallas CustomSplit mismatch vs reference"

    print("KERNEL_OK")
</pallas_src>

<mosaic_0001>
module attributes {stable_mosaic.version = 11 : i64} {
  func.func @_copy_kernel(%arg0: i32, %arg1: memref<8x1024xf32, #tpu.memory_space<vmem>>, %arg2: memref<8x1024xf32, #tpu.memory_space<vmem>>) attributes {dimension_semantics = [#tpu.dimension_semantics<parallel>], iteration_bounds = array<i64: 1>, scalar_prefetch = 0 : i64, scratch_operands = 0 : i64, tpu.core_type = #tpu.core_type<tc>, window_params = [{transform_indices = @transform_0, window_bounds = array<i64: 8, 1024>}, {transform_indices = @transform_1, window_bounds = array<i64: 8, 1024>}]} {
    %c0 = arith.constant 0 : index
    %c0_0 = arith.constant 0 : index
    %0 = vector.load %arg1[%c0, %c0_0] : memref<8x1024xf32, #tpu.memory_space<vmem>>, vector<8x1024xf32>
    %c0_1 = arith.constant 0 : index
    %c0_2 = arith.constant 0 : index
    %1 = vector.load %arg2[%c0_1, %c0_2] : memref<8x1024xf32, #tpu.memory_space<vmem>>, vector<8x1024xf32>
    tpu.vector_store %arg2[%c0_1, %c0_2], %0 {strides = array<i32>} : memref<8x1024xf32, #tpu.memory_space<vmem>>, vector<8x1024xf32>,
    return
  }
  func.func @transform_0(%arg0: i32) -> (i32, i32) {
    %c0_i32 = arith.constant 0 : i32
    %c0_i32_0 = arith.constant 0 : i32
    return %arg0, %c0_i32 : i32, i32
  }
  func.func @transform_1(%arg0: i32) -> (i32, i32) {
    %c0_i32 = arith.constant 0 : i32
    %c0_i32_0 = arith.constant 0 : i32
    return %arg0, %c0_i32 : i32, i32
  }
}

</mosaic_0001>

<bundles_post_ra>
// kernel: tpu_custom_call.1
= control target key start
LH: loop header
LB: loop body
LE: loop exit
PB: predicated region body
PF: predicated region fallthrough
CT: control target
= control target key end

     0   :  { %6 = vsyncpa [#allocation3], 0  ;;  %s138_s0 = inlined_call_operand.hbm [shape: f32[8,1024], index: 0, kind: input, shape index: {}]   ;;  %s139_s1 = inlined_call_operand.hbm [shape: f32[8,1024], index: 1, kind: output, shape index: {}]  }
   0x1   :  { %7 = vsyncpa [#allocation4], 0  ;;  %s102_s6 = smov [#allocation2]   ;;  %s54_s10 = scalar_lea.hbm %s138_s0, 1024 }
   0x2   :  { %s14_s7 = sshll.u32 %s102_s6, 4  ;;  %p55_p0 = scmp.ne.s32.totalorder %s138_s0, %s54_s10  ;;  %s15_s7 = int_to_ptr.vmem [resolvable:$true] %s14_s7 }
   0x3   :  { %p58_p1 = scmp.lt.u32.totalorder %s54_s10, %s138_s0 }
   0x5   :  { %p60_p2 = pnand %p58_p1, %p55_p0 }
   0x7   :  { %63 = shalt.err (!%p60_p2)
}
   0x8   :  { %s64_s15 = scalar_lea.vmem %s15_s7, 1024  ;;  %p69_p4 = scmp.lt.s32.totalorder %s15_s7, %s15_s7 }
   0x9   :  { %p65_p3 = scmp.ne.s32.totalorder %s15_s7, %s64_s15  ;;  %p70_p5 = scmp.lt.s32.totalorder %s64_s15, %s64_s15 }
   0xb   :  { %p71_p6 = por %p70_p5, %p69_p4 }
   0xd   :  { %p72_p7 = pnand %p71_p6, %p65_p3 }
   0xf   :  { %75 = shalt.err (!%p72_p7)
}
  0x10   :  { %17 = dma.hbm_to_vmem [thread:$0]  %s138_s0, 1024, %s15_s7, [#allocation3]  }
  0x11   :  { %98 = dma.done.wait [#allocation3], 1024  }
  0x12   :  { %99 = vsyncadd [#allocation3], 4294966272  ;;  %s103_s18 = smov [#allocation5]   ;;  %v21_v0 = vld [vmem:[#allocation2] sm:$0xff]  ;;  %v22_v1 = vld [vmem:[#allocation2 + $0x8] sm:$0xff] }
  0x13   :  { %s43_s19 = sshll.u32 %s103_s18, 4  ;;  %v23_v2 = vld [vmem:[#allocation2 + $0x10] sm:$0xff]  ;;  %29 = vst [vmem:[#allocation5] sm:$0xff] %v21_v0  ;;  %30 = vst [vmem:[#allocation5 + $0x8] sm:$0xff] %v22_v1  ;;  %v24_v3 = vld [vmem:[#allocation2 + $0x18] sm:$0xff]  ;;  %s44_s19 = int_to_ptr.vmem [resolvable:$true] %s43_s19 }
  0x14   :  { %31 = vst [vmem:[#allocation5 + $0x10] sm:$0xff] %v23_v2  ;;  %v25_v4 = vld [vmem:[#allocation2 + $0x20] sm:$0xff]  ;;  %v26_v5 = vld [vmem:[#allocation2 + $0x28] sm:$0xff]  ;;  %32 = vst [vmem:[#allocation5 + $0x18] sm:$0xff] %v24_v3  ;;  %s76_s0 = scalar_lea.vmem %s44_s19, 1024  ;;  %p81_p9 = scmp.lt.s32.totalorder %s44_s19, %s44_s19 }
  0x15   :  { %33 = vst [vmem:[#allocation5 + $0x20] sm:$0xff] %v25_v4  ;;  %34 = vst [vmem:[#allocation5 + $0x28] sm:$0xff] %v26_v5  ;;  %v27_v6 = vld [vmem:[#allocation2 + $0x30] sm:$0xff]  ;;  %v28_v7 = vld [vmem:[#allocation2 + $0x38] sm:$0xff]  ;;  %p77_p8 = scmp.ne.s32.totalorder %s44_s19, %s76_s0  ;;  %p82_p10 = scmp.lt.s32.totalorder %s76_s0, %s76_s0 }
  0x16   :  { %35 = vst [vmem:[#allocation5 + $0x30] sm:$0xff] %v27_v6  ;;  %36 = vst [vmem:[#allocation5 + $0x38] sm:$0xff] %v28_v7 }
  0x17   :  { %p83_p11 = por %p82_p10, %p81_p9 }
  0x19   :  { %p84_p12 = pnand %p83_p11, %p77_p8 }
  0x1b   :  { %87 = shalt.err (!%p84_p12)
}
  0x1c   :  { %s88_s22 = scalar_lea.hbm %s139_s1, 1024 }
  0x1d   :  { %p89_p13 = scmp.ne.s32.totalorder %s139_s1, %s88_s22  ;;  %p92_p0 = scmp.lt.u32.totalorder %s88_s22, %s139_s1 }
  0x1f   :  { %p94_p1 = pnand %p92_p0, %p89_p13 }
  0x21   :  { %97 = shalt.err (!%p94_p1)
}
  0x22   :  { %46 = dma.vmem_to_hbm [thread:$0]  %s44_s19, 1024, %s139_s1, [#allocation4]  }
  0x23   :  { %100 = dma.done.wait [#allocation4], 1024  }
  0x24   :  { %101 = vsyncadd [#allocation4], 4294966272 }
  0x25   :  { %50 = vsyncpa [#allocation3], 1 }
  0x26   :  { %51 = vsyncpa [#allocation4], 1 }

</bundles_post_ra>
